<compile_context>
chip_gen: v7x
topology: tpu7x:2x2x1
jax: 0.10.0
libtpu: 0.0.40
codegen_flags: <defaults>
</compile_context>

<pallas_src>
import numpy as np
import jax
import jax.numpy as jnp
from jax.experimental import pallas as pl
from jax.experimental.pallas import tpu as pltpu

C_OUT = 4
H = W = 8
HW = H * W              # 64 pixels, laid along lanes (p = i*8 + j)
LANES = C_OUT * HW      # 256 = conv channels side-by-side along lanes
NPAD = 128              # fc output padded to one full lane tile -> unmasked stores


def cnn_kernel(x_ref, wtap_ref, w2_ref, bias_ref, out_ref):
    """conv(3x3, pad=1) -> avgpool(2x2) -> flatten -> fc, fully fused.

    x_ref   : (B, 64)      f32  VMEM  raw 8x8 image, lane p = i*8 + j
    wtap_ref: (9, 1, 256)  f32  VMEM  conv tap weights broadcast per 64-lane channel
                                      group, zero-padding edge masks folded in
    w2_ref  : (256, 128)   f32  VMEM  avgpool + NCHW-flatten + fc folded (row = c*64+i*8+j)
    bias_ref: (1, 128)     f32  VMEM  fc bias + conv bias folded through pool+fc (padded)
    out_ref : (B, 128)     f32  VMEM  lane-dense padded logits
    """
    x64 = x_ref[...]                                            # (B, 64)
    # Channels-in-lanes: replicate the image into the 4 channel groups -> (B, 256).
    x256 = jnp.concatenate([x64, x64, x64, x64], axis=1)

    # 9 conv taps = 9 XLU lane rolls (otherwise-idle slot) + 9 full-width VPU
    # multiplies against the masked lane weights (no SMEM scalar loads).
    parts = []
    for t in range(9):
        di, dj = t // 3, t % 3
        off = (di - 1) * W + (dj - 1)                           # flat-index shift of tap
        tap = pltpu.roll(x256, (-off) % LANES, axis=1) if off else x256
        parts.append(wtap_ref[t] * tap)                         # (1,256)*(B,256)

    # Tree reduction: no f32 FMA on the VPU, so keep the dependent add chain short.
    s0 = parts[0] + parts[1]
    s1 = parts[2] + parts[3]
    s2 = parts[4] + parts[5]
    s3 = parts[6] + parts[7]
    conv = ((s0 + s1) + (s2 + s3)) + parts[8]                   # (B, 256) conv activations

    # Single K=256 MXU dot: pool + flatten + fc all folded into w2; bias in epilogue.
    out_ref[...] = (
        jnp.dot(conv, w2_ref[...], preferred_element_type=jnp.float32) + bias_ref[...]
    )


def _fold_params(wconv, bconv, wfc, bfc):
    """Host-side, once-per-model folding of every static weight (hoisted out of
    the per-call path per the perf review)."""
    n_classes = wfc.shape[0]
    assert n_classes <= NPAD
    wconv = np.asarray(wconv, np.float32).reshape(C_OUT, 3, 3)
    bconv = np.asarray(bconv, np.float32)
    wfc = np.asarray(wfc, np.float32)
    bfc = np.asarray(bfc, np.float32)

    # (9, 1, 256) masked lane weights: w_tap[t, 0, c*64 + i*8 + j] =
    #   wconv[c, di, dj] if the tap pixel (i+di-1, j+dj-1) is inside the image, else 0.
    w_tap = np.zeros((9, 1, LANES), np.float32)
    for t in range(9):
        di, dj = t // 3, t % 3
        mask = np.zeros(HW, np.float32)
        for i in range(H):
            for j in range(W):
                if 0 <= i + di - 1 < H and 0 <= j + dj - 1 < W:
                    mask[i * W + j] = 1.0
        for c in range(C_OUT):
            w_tap[t, 0, c * HW:(c + 1) * HW] = wconv[c, di, dj] * mask

    # (256, 128) folded AvgPool2d(2,2) + NCHW flatten + fc1:
    #   w2[c*64 + i*8 + j, k] = 0.25 * wfc[k, c*16 + (i//2)*4 + (j//2)]
    w2 = wfc.reshape(n_classes, C_OUT, H // 2, W // 2)
    w2 = 0.25 * np.repeat(np.repeat(w2, 2, axis=2), 2, axis=3)      # (k, 4, 8, 8)
    w2 = np.ascontiguousarray(w2.reshape(n_classes, LANES).T)       # (256, k)
    w2 = np.pad(w2, ((0, 0), (0, NPAD - n_classes))).astype(np.float32)

    # Conv bias survives the avg-pool unchanged, so fold it through fc into the bias.
    b_eff = bfc + wfc @ np.repeat(bconv, (H // 2) * (W // 2))
    bias_p = np.pad(b_eff, (0, NPAD - n_classes)).reshape(1, NPAD).astype(np.float32)

    return jnp.asarray(w_tap), jnp.asarray(w2), jnp.asarray(bias_p), n_classes


def make_cnn_forward(wconv, bconv, wfc, bfc):
    """Prepare folded parameters once and return a jitted forward(x)."""
    w_tap, w2, bias_p, n_classes = _fold_params(wconv, bconv, wfc, bfc)

    @jax.jit
    def forward(x):
        B = x.shape[0]
        x_flat = x.reshape(B, HW).astype(jnp.float32)   # (B,1,8,8)->(B,64), layout no-op

        # TODO(synk): if batch ever scales beyond toy size, add a leading batch grid
        # axis with dimension_semantics=(pltpu.PARALLEL,) so v7x's two TensorCores
        # each take half the batch; keep the batch block large on v5e/v6e where a
        # grid is just sequential per-step overhead.
        out_pad = pl.pallas_call(
            cnn_kernel,
            out_shape=jax.ShapeDtypeStruct((B, NPAD), jnp.float32),
            in_specs=[
                pl.BlockSpec(memory_space=pltpu.MemorySpace.VMEM),   # raw image
                pl.BlockSpec(memory_space=pltpu.MemorySpace.VMEM),   # masked conv lane weights
                pl.BlockSpec(memory_space=pltpu.MemorySpace.VMEM),   # folded pool+flatten+fc
                pl.BlockSpec(memory_space=pltpu.MemorySpace.VMEM),   # folded bias (padded)
            ],
            out_specs=pl.BlockSpec(memory_space=pltpu.MemorySpace.VMEM),
        )(x_flat, w_tap, w2, bias_p)
        return out_pad[:, :n_classes]

    return forward


def cnn_reference(x, wconv, bconv, wfc, bfc):
    """Pure-JAX reference mirroring the PyTorch module."""
    conv = jax.lax.conv_general_dilated(
        x, wconv, window_strides=(1, 1), padding="SAME",
        dimension_numbers=("NCHW", "OIHW", "NCHW"),
    ) + bconv.reshape(1, C_OUT, 1, 1)
    B = x.shape[0]
    pooled = conv.reshape(B, C_OUT, 4, 2, 4, 2).mean(axis=(3, 5))   # AvgPool2d(2,2)
    flat = pooled.reshape(B, C_OUT * 4 * 4)                         # flatten(1)
    return flat @ wfc.T + bfc                                       # fc1


if __name__ == "__main__":
    n_classes = 10
    B = 8

    key = jax.random.PRNGKey(0)
    k1, k2, k3, k4, kx = jax.random.split(key, 5)
    # deterministic synthetic parameters (PyTorch-default-like uniform fan-in bounds)
    wconv = jax.random.uniform(k1, (4, 1, 3, 3), jnp.float32, -1.0 / 3, 1.0 / 3)
    bconv = jax.random.uniform(k2, (4,), jnp.float32, -1.0 / 3, 1.0 / 3)
    wfc = jax.random.uniform(k3, (n_classes, 64), jnp.float32, -0.125, 0.125)
    bfc = jax.random.uniform(k4, (n_classes,), jnp.float32, -0.125, 0.125)
    x = jax.random.uniform(kx, (B, 1, 8, 8), jnp.float32, 0.0, 1.0)

    cnn_forward = make_cnn_forward(wconv, bconv, wfc, bfc)
    out = jax.block_until_ready(cnn_forward(x))

    ref = cnn_reference(x, wconv, bconv, wfc, bfc)
    assert out.shape == (B, n_classes)
    err = float(jnp.max(jnp.abs(out - ref)))
    assert jnp.allclose(out, ref, atol=1e-3, rtol=1e-3), f"max abs err {err}"
    print("KERNEL_OK")
</pallas_src>

<mosaic_0001>
module attributes {stable_mosaic.version = 11 : i64} {
  func.func @cnn_kernel(%arg0: memref<8x64xf32, #tpu.memory_space<vmem>>, %arg1: memref<9x1x256xf32, #tpu.memory_space<vmem>>, %arg2: memref<256x128xf32, #tpu.memory_space<vmem>>, %arg3: memref<1x128xf32, #tpu.memory_space<vmem>>, %arg4: memref<8x128xf32, #tpu.memory_space<vmem>>) attributes {dimension_semantics = [], scalar_prefetch = 0 : i64, scratch_operands = 0 : i64, tpu.core_type = #tpu.core_type<tc>} {
    %c0 = arith.constant 0 : index
    %c0_0 = arith.constant 0 : index
    %0 = vector.load %arg0[%c0, %c0_0] : memref<8x64xf32, #tpu.memory_space<vmem>>, vector<8x64xf32>
    %1 = tpu.concatenate %0, %0, %0, %0 in 1 : vector<8x64xf32>, vector<8x64xf32>, vector<8x64xf32>, vector<8x64xf32> -> vector<8x256xf32>
    %c9_i32 = arith.constant 9 : i32
    %2 = tpu.dynamic_rotate %1 by %c9_i32 dim 1 : vector<8x256xf32>, i32 -> vector<8x256xf32>
    %c0_1 = arith.constant 0 : index
    %c0_2 = arith.constant 0 : index
    %c0_3 = arith.constant 0 : index
    %3 = vector.load %arg1[%c0_1, %c0_2, %c0_3] : memref<9x1x256xf32, #tpu.memory_space<vmem>>, vector<1x1x256xf32>
    %4 = vector.shape_cast %3 : vector<1x1x256xf32> to vector<1x256xf32>
    %5 = vector.broadcast %4 : vector<1x256xf32> to vector<8x256xf32>
    %6 = arith.mulf %5, %2 : vector<8x256xf32>
    %c8_i32 = arith.constant 8 : i32
    %7 = tpu.dynamic_rotate %1 by %c8_i32 dim 1 : vector<8x256xf32>, i32 -> vector<8x256xf32>
    %c1 = arith.constant 1 : index
    %c0_4 = arith.constant 0 : index
    %c0_5 = arith.constant 0 : index
    %8 = vector.load %arg1[%c1, %c0_4, %c0_5] : memref<9x1x256xf32, #tpu.memory_space<vmem>>, vector<1x1x256xf32>
    %9 = vector.shape_cast %8 : vector<1x1x256xf32> to vector<1x256xf32>
    %10 = vector.broadcast %9 : vector<1x256xf32> to vector<8x256xf32>
    %11 = arith.mulf %10, %7 : vector<8x256xf32>
    %c7_i32 = arith.constant 7 : i32
    %12 = tpu.dynamic_rotate %1 by %c7_i32 dim 1 : vector<8x256xf32>, i32 -> vector<8x256xf32>
    %c2 = arith.constant 2 : index
    %c0_6 = arith.constant 0 : index
    %c0_7 = arith.constant 0 : index
    %13 = vector.load %arg1[%c2, %c0_6, %c0_7] : memref<9x1x256xf32, #tpu.memory_space<vmem>>, vector<1x1x256xf32>
    %14 = vector.shape_cast %13 : vector<1x1x256xf32> to vector<1x256xf32>
    %15 = vector.broadcast %14 : vector<1x256xf32> to vector<8x256xf32>
    %16 = arith.mulf %15, %12 : vector<8x256xf32>
    %c1_i32 = arith.constant 1 : i32
    %17 = tpu.dynamic_rotate %1 by %c1_i32 dim 1 : vector<8x256xf32>, i32 -> vector<8x256xf32>
    %c3 = arith.constant 3 : index
    %c0_8 = arith.constant 0 : index
    %c0_9 = arith.constant 0 : index
    %18 = vector.load %arg1[%c3, %c0_8, %c0_9] : memref<9x1x256xf32, #tpu.memory_space<vmem>>, vector<1x1x256xf32>
    %19 = vector.shape_cast %18 : vector<1x1x256xf32> to vector<1x256xf32>
    %20 = vector.broadcast %19 : vector<1x256xf32> to vector<8x256xf32>
    %21 = arith.mulf %20, %17 : vector<8x256xf32>
    %c4 = arith.constant 4 : index
    %c0_10 = arith.constant 0 : index
    %c0_11 = arith.constant 0 : index
    %22 = vector.load %arg1[%c4, %c0_10, %c0_11] : memref<9x1x256xf32, #tpu.memory_space<vmem>>, vector<1x1x256xf32>
    %23 = vector.shape_cast %22 : vector<1x1x256xf32> to vector<1x256xf32>
    %24 = vector.broadcast %23 : vector<1x256xf32> to vector<8x256xf32>
    %25 = arith.mulf %24, %1 : vector<8x256xf32>
    %c255_i32 = arith.constant 255 : i32
    %26 = tpu.dynamic_rotate %1 by %c255_i32 dim 1 : vector<8x256xf32>, i32 -> vector<8x256xf32>
    %c5 = arith.constant 5 : index
    %c0_12 = arith.constant 0 : index
    %c0_13 = arith.constant 0 : index
    %27 = vector.load %arg1[%c5, %c0_12, %c0_13] : memref<9x1x256xf32, #tpu.memory_space<vmem>>, vector<1x1x256xf32>
    %28 = vector.shape_cast %27 : vector<1x1x256xf32> to vector<1x256xf32>
    %29 = vector.broadcast %28 : vector<1x256xf32> to vector<8x256xf32>
    %30 = arith.mulf %29, %26 : vector<8x256xf32>
    %c249_i32 = arith.constant 249 : i32
    %31 = tpu.dynamic_rotate %1 by %c249_i32 dim 1 : vector<8x256xf32>, i32 -> vector<8x256xf32>
    %c6 = arith.constant 6 : index
    %c0_14 = arith.constant 0 : index
    %c0_15 = arith.constant 0 : index
    %32 = vector.load %arg1[%c6, %c0_14, %c0_15] : memref<9x1x256xf32, #tpu.memory_space<vmem>>, vector<1x1x256xf32>
    %33 = vector.shape_cast %32 : vector<1x1x256xf32> to vector<1x256xf32>
    %34 = vector.broadcast %33 : vector<1x256xf32> to vector<8x256xf32>
    %35 = arith.mulf %34, %31 : vector<8x256xf32>
    %c248_i32 = arith.constant 248 : i32
    %36 = tpu.dynamic_rotate %1 by %c248_i32 dim 1 : vector<8x256xf32>, i32 -> vector<8x256xf32>
    %c7 = arith.constant 7 : index
    %c0_16 = arith.constant 0 : index
    %c0_17 = arith.constant 0 : index
    %37 = vector.load %arg1[%c7, %c0_16, %c0_17] : memref<9x1x256xf32, #tpu.memory_space<vmem>>, vector<1x1x256xf32>
    %38 = vector.shape_cast %37 : vector<1x1x256xf32> to vector<1x256xf32>
    %39 = vector.broadcast %38 : vector<1x256xf32> to vector<8x256xf32>
    %40 = arith.mulf %39, %36 : vector<8x256xf32>
    %c247_i32 = arith.constant 247 : i32
    %41 = tpu.dynamic_rotate %1 by %c247_i32 dim 1 : vector<8x256xf32>, i32 -> vector<8x256xf32>
    %c8 = arith.constant 8 : index
    %c0_18 = arith.constant 0 : index
    %c0_19 = arith.constant 0 : index
    %42 = vector.load %arg1[%c8, %c0_18, %c0_19] : memref<9x1x256xf32, #tpu.memory_space<vmem>>, vector<1x1x256xf32>
    %43 = vector.shape_cast %42 : vector<1x1x256xf32> to vector<1x256xf32>
    %44 = vector.broadcast %43 : vector<1x256xf32> to vector<8x256xf32>
    %45 = arith.mulf %44, %41 : vector<8x256xf32>
    %46 = arith.addf %6, %11 : vector<8x256xf32>
    %47 = arith.addf %16, %21 : vector<8x256xf32>
    %48 = arith.addf %25, %30 : vector<8x256xf32>
    %49 = arith.addf %35, %40 : vector<8x256xf32>
    %50 = arith.addf %46, %47 : vector<8x256xf32>
    %51 = arith.addf %48, %49 : vector<8x256xf32>
    %52 = arith.addf %50, %51 : vector<8x256xf32>
    %53 = arith.addf %52, %45 : vector<8x256xf32>
    %c0_20 = arith.constant 0 : index
    %c0_21 = arith.constant 0 : index
    %54 = vector.load %arg2[%c0_20, %c0_21] : memref<256x128xf32, #tpu.memory_space<vmem>>, vector<256x128xf32>
    %cst = arith.constant dense<0.000000e+00> : vector<8x128xf32>
    %55 = tpu.matmul %53, %54, %cst {dimension_numbers = #tpu.dot_dimension_numbers<[1], [0], [0], [1], [0, 0, 1, 1], [], []>} : vector<8x256xf32>, vector<256x128xf32>, vector<8x128xf32> -> vector<8x128xf32>
    %c0_22 = arith.constant 0 : index
    %c0_23 = arith.constant 0 : index
    %56 = vector.load %arg3[%c0_22, %c0_23] : memref<1x128xf32, #tpu.memory_space<vmem>>, vector<1x128xf32>
    %57 = vector.broadcast %56 : vector<1x128xf32> to vector<8x128xf32>
    %58 = arith.addf %55, %57 : vector<8x128xf32>
    %c0_24 = arith.constant 0 : index
    %c0_25 = arith.constant 0 : index
    %59 = vector.load %arg4[%c0_24, %c0_25] : memref<8x128xf32, #tpu.memory_space<vmem>>, vector<8x128xf32>
    tpu.vector_store %arg4[%c0_24, %c0_25], %58 {strides = array<i32>} : memref<8x128xf32, #tpu.memory_space<vmem>>, vector<8x128xf32>,
    return
  }
}

</mosaic_0001>

<bundles_post_ra>
// kernel: forward.1
= control target key start
LH: loop header
LB: loop body
LE: loop exit
PB: predicated region body
PF: predicated region fallthrough
CT: control target
= control target key end

     0   :  { %9 = vsyncpa [#allocation3], 0  ;;  %s576_s0 = inlined_call_operand.vmem [shape: f32[8,64], index: 0, kind: input, shape index: {}]   ;;  %s577_s1 = inlined_call_operand.vmem [shape: f32[9,1,256], index: 1, kind: input, shape index: {}]   ;;  %s578_s2 = inlined_call_operand.hbm [shape: f32[256,128], index: 2, kind: input, shape index: {}]   ;;  %s579_s3 = inlined_call_operand.vmem [shape: f32[1,128], index: 3, kind: input, shape index: {}]   ;;  %s580_s4 = inlined_call_operand.hbm [shape: f32[8,128], index: 4, kind: output, shape index: {}]  }
   0x1   :  { %10 = vsyncpa [#allocation4], 0  ;;  %s468_s15 = smov [#allocation2]   ;;  %s420_s19 = scalar_lea.hbm %s578_s2, 4096 }
   0x2   :  { %s20_s16 = sshll.u32 %s468_s15, 4  ;;  %p421_p0 = scmp.ne.s32.totalorder %s578_s2, %s420_s19  ;;  %s21_s16 = int_to_ptr.vmem [resolvable:$true] %s20_s16 }
   0x3   :  { %p424_p1 = scmp.lt.u32.totalorder %s420_s19, %s578_s2 }
   0x5   :  { %p426_p2 = pnand %p424_p1, %p421_p0 }
   0x7   :  { %429 = shalt.err (!%p426_p2)
}
   0x8   :  { %s430_s24 = scalar_lea.vmem %s21_s16, 4096  ;;  %p435_p4 = scmp.lt.s32.totalorder %s21_s16, %s21_s16 }
   0x9   :  { %p431_p3 = scmp.ne.s32.totalorder %s21_s16, %s430_s24  ;;  %p436_p5 = scmp.lt.s32.totalorder %s430_s24, %s430_s24 }
   0xb   :  { %p437_p6 = por %p436_p5, %p435_p4 }
   0xd   :  { %p438_p7 = pnand %p437_p6, %p431_p3 }
   0xf   :  { %441 = shalt.err (!%p438_p7)
}
  0x10   :  { %s469_s25 = smov 128   ;;  %s470_s26 = smov 8  }
  0x11   :  { %26 = dma.hbm_to_vmem [thread:$0]  %s578_s2, 4096, %s21_s16, [#allocation3], %s469_s25, %s469_s25, %s470_s26  }
  0x12   :  { %464 = dma.done.wait [#allocation3], 4096  }
  0x13   :  { %465 = vsyncadd [#allocation3], 4294963200  ;;  %v32_v0 = vld [vmem:[%s576_s0] sm:$0xff]  ;;  %s471_s5 = smov 64   ;;  %v224_v2 = vld [vmem:[#allocation2 + $0x88] sm:$0xff]  ;;  %vm37_vm0 = vcmask 523264   ;;  %v45_v51 = vlaneseq }
  0x14   :  { %34 = vrot.lane.b32.xlu0 %v32_v0, %s471_s5  ;;  %v223_v1 = vld [vmem:[#allocation2 + $0x80] sm:$0xff]  ;;  %v208_v5 = vld [vmem:[#allocation2 + $0x8] sm:$0xff]  ;;  %v225_v6 = vld [vmem:[#allocation2 + $0x90] sm:$0xff]  ;;  %s472_s0 = smov 9   ;;  %s473_s2 = smov 7  }
  0x15   :  { %v207_v3 = vld [vmem:[#allocation2] sm:$0xff]  ;;  %v376_v4 = vpack.c.bf16 %v224_v2, %v223_v1  ;;  %v226_v7 = vld [vmem:[#allocation2 + $0x98] sm:$0xff]  ;;  %v209_v10 = vld [vmem:[#allocation2 + $0x10] sm:$0xff]  ;;  %s474_s6 = smov 1   ;;  %s475_s7 = smov 127   ;;  %v46_v52 = vshrl.u32 %v45_v51, 7 }
  0x16   :  { %v378_v8 = vpack.c.bf16 %v208_v5, %v207_v3  ;;  %v380_v9 = vpack.c.bf16 %v226_v7, %v225_v6  ;;  %v210_v11 = vld [vmem:[#allocation2 + $0x18] sm:$0xff]  ;;  %v227_v12 = vld [vmem:[#allocation2 + $0xa0] sm:$0xff]  ;;  %v228_v13 = vld [vmem:[#allocation2 + $0xa8] sm:$0xff]  ;;  %s476_s8 = smov 121   ;;  %s477_s9 = smov 120  }
  0x17   :  { %377 = vmatprep.subr.bf16.mxu0 %v376_v4  ;;  %v382_v14 = vpack.c.bf16 %v210_v11, %v209_v10  ;;  %v384_v15 = vpack.c.bf16 %v228_v13, %v227_v12  ;;  %v211_v16 = vld [vmem:[#allocation2 + $0x20] sm:$0xff]  ;;  %v212_v17 = vld [vmem:[#allocation2 + $0x28] sm:$0xff]  ;;  %v229_v19 = vld [vmem:[#allocation2 + $0xb0] sm:$0xff]  ;;  %s478_s10 = smov 119   ;;  %v47_v57 = vsub.s32 0, %v46_v52  ;;  %v51_v58 = vsub.s32 1, %v46_v52 }
  0x18   :  { %379 = vmatpush3.bf16.msra.mxu0 %v378_v8  ;;  %v386_v18 = vpack.c.bf16 %v212_v17, %v211_v16  ;;  %v230_v20 = vld [vmem:[#allocation2 + $0xb8] sm:$0xff]  ;;  %v213_v22 = vld [vmem:[#allocation2 + $0x30] sm:$0xff]  ;;  %v231_v25 = vld [vmem:[#allocation2 + $0xc0] sm:$0xff]  ;;  %s479_s30 = smov [#allocation5]  }
  0x19   :  { %381 = vmatprep.subr.bf16.mxu0 %v380_v9  ;;  %v388_v21 = vpack.c.bf16 %v230_v20, %v229_v19  ;;  %v214_v23 = vld [vmem:[#allocation2 + $0x38] sm:$0xff]  ;;  %v232_v26 = vld [vmem:[#allocation2 + $0xc8] sm:$0xff]  ;;  %v215_v28 = vld [vmem:[#allocation2 + $0x40] sm:$0xff]  ;;  %s323_s5 = sshll.u32 %s479_s30, 4  ;;  %s324_s5 = int_to_ptr.vmem [resolvable:$true] %s323_s5 }
  0x1a   :  { %v390_v24 = vpack.c.bf16 %v214_v23, %v213_v22  ;;  %v392_v27 = vpack.c.bf16 %v232_v26, %v231_v25  ;;  %v216_v29 = vld [vmem:[#allocation2 + $0x48] sm:$0xff]  ;;  %v233_v31 = vld [vmem:[#allocation2 + $0xd0] sm:$0xff]  ;;  %v234_v32 = vld [vmem:[#allocation2 + $0xd8] sm:$0xff]  ;;  %p447_p9 = scmp.lt.s32.totalorder %s324_s5, %s324_s5 }
  0x1b   :  { %v394_v30 = vpack.c.bf16 %v216_v29, %v215_v28  ;;  %v396_v33 = vpack.c.bf16 %v234_v32, %v233_v31  ;;  %v217_v34 = vld [vmem:[#allocation2 + $0x50] sm:$0xff]  ;;  %v218_v36 = vld [vmem:[#allocation2 + $0x58] sm:$0xff]  ;;  %v235_v39 = vld [vmem:[#allocation2 + $0xe0] sm:$0xff] }
  0x1c   :  { %383 = vmatpush3.bf16.msra.mxu0 %v382_v14  ;;  %v398_v38 = vpack.c.bf16 %v218_v36, %v217_v34  ;;  %v236_v40 = vld [vmem:[#allocation2 + $0xe8] sm:$0xff]  ;;  %v219_v42 = vld [vmem:[#allocation2 + $0x60] sm:$0xff]  ;;  %v237_v45 = vld [vmem:[#allocation2 + $0xf0] sm:$0xff] }
  0x1d   :  { %385 = vmatprep.subr.bf16.mxu0 %v384_v15  ;;  %v400_v41 = vpack.c.bf16 %v236_v40, %v235_v39  ;;  %v220_v43 = vld [vmem:[#allocation2 + $0x68] sm:$0xff]  ;;  %v238_v46 = vld [vmem:[#allocation2 + $0xf8] sm:$0xff]  ;;  %v221_v48 = vld [vmem:[#allocation2 + $0x70] sm:$0xff] }
  0x1e   :  { %v402_v44 = vpack.c.bf16 %v220_v43, %v219_v42  ;;  %v404_v47 = vpack.c.bf16 %v238_v46, %v237_v45  ;;  %v222_v49 = vld [vmem:[#allocation2 + $0x78] sm:$0xff]  ;;  %v333_v55 = vld [vmem:[%s577_s1 + $0x4] sm:$0x3]  ;;  %v334_v56 = vld [vmem:[%s577_s1 + $0x6] sm:$0x3] }
  0x1f   :  { %v406_v50 = vpack.c.bf16 %v222_v49, %v221_v48  ;;  %v332_v59 = vld [vmem:[%s577_s1 + $0x2] sm:$0x3]  ;;  %v43_v60 = vld [vmem:[%s577_s1] sm:$0x3]  ;;  %v82_v61 = vrot.slane %v333_v55, %v47_v57  ;;  %v86_v62 = vrot.slane %v333_v55, %v51_v58  ;;  %v103_v1 = vrot.slane %v334_v56, %v51_v58  ;;  %v335_v3 = vld [vmem:[%s577_s1 + $0x8] sm:$0x3] }
  0x20   :  { %387 = vmatpush3.bf16.msra.mxu0 %v386_v18  ;;  %v336_v4 = vld [vmem:[%s577_s1 + $0xa] sm:$0x3]  ;;  %v65_v5 = vrot.slane %v332_v59, %v47_v57  ;;  %v69_v6 = vrot.slane %v332_v59, %v51_v58  ;;  %v48_v7 = vrot.slane %v43_v60, %v47_v57  ;;  %v52_v8 = vrot.slane %v43_v60, %v51_v58  ;;  %v337_v9 = vld [vmem:[%s577_s1 + $0xc] sm:$0x3]  ;;  %v338_v10 = vld [vmem:[%s577_s1 + $0xe] sm:$0x3] }
  0x21   :  { %389 = vmatprep.subr.bf16.mxu0 %v388_v21  ;;  %v114_v11 = vrot.slane %v335_v3, %v47_v57  ;;  %v118_v12 = vrot.slane %v335_v3, %v51_v58  ;;  %v131_v13 = vrot.slane %v336_v4, %v47_v57  ;;  %v135_v14 = vrot.slane %v336_v4, %v51_v58  ;;  %v339_v31 = vld [vmem:[%s577_s1 + $0x10] sm:$0x3] }
  0x22   :  { %v148_v20 = vrot.slane %v337_v9, %v47_v57  ;;  %v152_v21 = vrot.slane %v337_v9, %v51_v58  ;;  %v165_v22 = vrot.slane %v338_v10, %v47_v57  ;;  %v169_v23 = vrot.slane %v338_v10, %v51_v58 }
  0x23   :  { %v186_v45 = vrot.slane %v339_v31, %v51_v58 }
  0x24   :  { %391 = vmatpush3.bf16.msra.mxu0 %v390_v24 }
  0x25   :  { %393 = vmatprep.subr.bf16.mxu0 %v392_v27 }
  0x28   :  { %395 = vmatpush3.bf16.msra.mxu0 %v394_v30 }
  0x29   :  { %397 = vmatprep.subr.bf16.mxu0 %v396_v33 }
  0x2c   :  { %399 = vmatpush3.bf16.msra.mxu0 %v398_v38 }
  0x2d   :  { %401 = vmatprep.subr.bf16.mxu0 %v400_v41 }
  0x30   :  { %403 = vmatpush3.bf16.msra.mxu0 %v402_v44  ;;  %v182_v44 = vrot.slane %v339_v31, %v47_v57 }
  0x31   :  { %405 = vmatprep.subr.bf16.mxu0 %v404_v47 }
  0x34   :  { %407 = vmatpush3.bf16.msra.mxu0 %v406_v50 }
  0x86   :  { %v35_v35 = vpop.permute.xlu0 %34 }
  0x87   :  { %v521_v37 = vsel %vm37_vm0, %v32_v0, %v35_v35  ;;  %v99_v0 = vrot.slane %v334_v56, %v47_v57  ;;  %v340_v57 = vld [vmem:[%s579_s3] ss:$0 sm:$0xff] }
  0x88   :  { %57 = vrot.lane.b32.xlu1 %v521_v37, %s470_s26  ;;  %39 = vrot.lane.b32.xlu0 %v521_v37, %s472_s0  ;;  %v121_v34 = vmul.f32 %v114_v11, %v521_v37  ;;  %v122_v35 = vmul.f32 %v118_v12, %v521_v37  ;;  %s442_s0 = scalar_lea.vmem %s324_s5, 128 }
  0x89   :  { %p443_p8 = scmp.ne.s32.totalorder %s324_s5, %s442_s0  ;;  %p448_p10 = scmp.lt.s32.totalorder %s442_s0, %s442_s0 }
  0x8b   :  { %p449_p11 = por %p448_p10, %p447_p9 }
  0x8c   :  { %74 = vrot.lane.b32.xlu1 %v521_v37, %s473_s2  ;;  %91 = vrot.lane.b32.xlu0 %v521_v37, %s474_s6 }
  0x8d   :  { %p450_p12 = pnand %p449_p11, %p443_p8 }
  0x90   :  { %123 = vrot.lane.b32.xlu1 %v521_v37, %s475_s7  ;;  %140 = vrot.lane.b32.xlu0 %v521_v37, %s476_s8 }
  0x94   :  { %157 = vrot.lane.b32.xlu1 %v521_v37, %s477_s9  ;;  %174 = vrot.lane.b32.xlu0 %v521_v37, %s478_s10 }
  0xfa   :  { %v58_v53 = vpop.permute.xlu1 %57  ;;  %v40_v54 = vpop.permute.xlu0 %39 }
  0xfb   :  { %v72_v24 = vmul.f32 %v65_v5, %v58_v53  ;;  %v73_v25 = vmul.f32 %v69_v6, %v58_v53  ;;  %v55_v26 = vmul.f32 %v48_v7, %v40_v54  ;;  %v56_v27 = vmul.f32 %v52_v8, %v40_v54 }
  0xfd   :  { %v191_v42 = vadd.f32 %v72_v24, %v55_v26  ;;  %v192_v43 = vadd.f32 %v73_v25, %v56_v27 }
  0xfe   :  { %v75_v63 = vpop.permute.xlu1 %74  ;;  %v92_v2 = vpop.permute.xlu0 %91 }
  0xff   :  { %v89_v15 = vmul.f32 %v82_v61, %v75_v63  ;;  %v90_v16 = vmul.f32 %v86_v62, %v75_v63  ;;  %v106_v17 = vmul.f32 %v99_v0, %v92_v2  ;;  %v107_v18 = vmul.f32 %v103_v1, %v92_v2 }
 0x101   :  { %v193_v32 = vadd.f32 %v106_v17, %v89_v15  ;;  %v194_v33 = vadd.f32 %v107_v18, %v90_v16 }
 0x102   :  { %v124_v19 = vpop.permute.xlu1 %123  ;;  %v141_v28 = vpop.permute.xlu0 %140 }
 0x103   :  { %v138_v29 = vmul.f32 %v131_v13, %v124_v19  ;;  %v139_v30 = vmul.f32 %v135_v14, %v124_v19  ;;  %v155_v38 = vmul.f32 %v148_v20, %v141_v28  ;;  %v156_v39 = vmul.f32 %v152_v21, %v141_v28 }
 0x104   :  { %v199_v51 = vadd.f32 %v193_v32, %v191_v42  ;;  %v200_v53 = vadd.f32 %v194_v33, %v192_v43 }
 0x105   :  { %v195_v46 = vadd.f32 %v138_v29, %v121_v34  ;;  %v196_v47 = vadd.f32 %v139_v30, %v122_v35 }
 0x106   :  { %v158_v36 = vpop.permute.xlu1 %157  ;;  %v175_v50 = vpop.permute.xlu0 %174 }
 0x107   :  { %v172_v40 = vmul.f32 %v165_v22, %v158_v36  ;;  %v173_v41 = vmul.f32 %v169_v23, %v158_v36  ;;  %v189_v55 = vmul.f32 %v182_v44, %v175_v50  ;;  %v190_v37 = vmul.f32 %v186_v45, %v175_v50 }
 0x109   :  { %v197_v48 = vadd.f32 %v172_v40, %v155_v38  ;;  %v198_v49 = vadd.f32 %v173_v41, %v156_v39 }
 0x10b   :  { %v201_v52 = vadd.f32 %v197_v48, %v195_v46  ;;  %v202_v54 = vadd.f32 %v198_v49, %v196_v47 }
 0x10d   :  { %v203_v56 = vadd.f32 %v201_v52, %v199_v51  ;;  %v204_v59 = vadd.f32 %v202_v54, %v200_v53 }
 0x10f   :  { %v205_v60 = vadd.f32 %v203_v56, %v189_v55  ;;  %v206_v61 = vadd.f32 %v204_v59, %v190_v37 }
 0x111   :  { %310 = vmatprep.mubr.f32.mxu0 %v206_v61 }
 0x112   :  { %311 = vmatmul.mubr.f32.vlgmr.msra.gmra.mrb[0].mxu0 %v205_v60 }
 0x1e5   :  { %v373_v62 = vpop.f32.mrb[0].mxu0 }
 0x1e6   :  { %v374_v58 = vpop.f32.mrb[1].mxu0 }
 0x1e7   :  { %v375_v63 = vadd.f32 %v374_v58, %v373_v62 }
 0x1e9   :  { %v313_v0 = vadd.f32 %v375_v63, %v340_v57 }
 0x1eb   :  { %316 = vst [vmem:[#allocation5] sm:$0xff] %v313_v0 }
 0x1ec   :  { %453 = shalt.err (!%p450_p12)
}
 0x1ed   :  { %s454_s7 = scalar_lea.hbm %s580_s4, 128 }
 0x1ee   :  { %p455_p13 = scmp.ne.s32.totalorder %s580_s4, %s454_s7  ;;  %p458_p0 = scmp.lt.u32.totalorder %s454_s7, %s580_s4 }
 0x1f0   :  { %p460_p1 = pnand %p458_p0, %p455_p13 }
 0x1f2   :  { %463 = shalt.err (!%p460_p1)
}
 0x1f3   :  { %326 = dma.vmem_to_hbm [thread:$0]  %s324_s5, 128, %s580_s4, [#allocation4]  }
 0x1f4   :  { %466 = dma.done.wait [#allocation4], 128  }
 0x1f5   :  { %467 = vsyncadd [#allocation4], 4294967168 }
 0x1f6   :  { %330 = vsyncpa [#allocation3], 1 }
 0x1f7   :  { %331 = vsyncpa [#allocation4], 1 }

</bundles_post_ra>
